<compile_context>
chip_gen: v7x
topology: tpu7x:2x2x1
jax: 0.10.0
libtpu: 0.0.40
codegen_flags: <defaults>
</compile_context>

<pallas_src>
import jax
import jax.numpy as jnp
import numpy as np
from jax.experimental import pallas as pl
from jax.experimental.pallas import tpu as pltpu


def _polgrad_kernel(x_ref, w1t_ref, w2t_ref, o_ref):
    x = x_ref[...]        # [TB, F] f32
    w1t = w1t_ref[...]    # [F, H]  f32  (dense1.weight pre-transposed once at init)
    w2t = w2t_ref[...]    # [H, A]  f32  (dense2.weight pre-transposed once at init)

    # dense1 + ReLU (f32 on the MXU).
    h = jnp.dot(x, w1t, preferred_element_type=jnp.float32)      # [TB, H]
    h = jnp.maximum(h, 0.0)

    # Dropout(0.6): identity in eval mode (deterministic forward pass).
    # TODO(synk): training-mode dropout would need pltpu.prng_seed /
    # pltpu.prng_random_bits and a 1/(1-p) rescale.

    # dense2 (keep f32 hidden activations; second matmul is negligible anyway).
    logits = jnp.dot(h, w2t, preferred_element_type=jnp.float32)  # [TB, A]

    # Numerically-stable softmax over the action (last) axis, exact divide so
    # each row sums to 1 at f32 precision (matters for log pi / sampling).
    m = jnp.max(logits, axis=-1, keepdims=True)
    e = jnp.exp(logits - m)
    denom = jnp.sum(e, axis=-1, keepdims=True)
    o_ref[...] = (e / denom).astype(o_ref.dtype)


def polgrad_forward(x, w1t, w2t, *, tile_b=128):
    """Fused PolGrad forward.

    x:   [B, n_features]  f32
    w1t: [n_features, 64] f32   (dense1.weight transposed once at init)
    w2t: [64, n_actions]  f32   (dense2.weight transposed once at init)
    """
    B, F = x.shape
    F2, H = w1t.shape
    H2, A = w2t.shape
    assert F == F2 and H == H2

    x = jnp.asarray(x, jnp.float32)
    w1t = jnp.asarray(w1t, jnp.float32)
    w2t = jnp.asarray(w2t, jnp.float32)

    # Batched / tiled path: many rollout states per call. Batch axis tiled and
    # marked "parallel" so v7x's two TensorCores split it (no-op on v5e/v6e).
    if tile_b is not None and B > tile_b and B % tile_b == 0:
        return pl.pallas_call(
            _polgrad_kernel,
            out_shape=jax.ShapeDtypeStruct((B, A), jnp.float32),
            grid=(B // tile_b,),
            in_specs=[
                pl.BlockSpec((tile_b, F), lambda i: (i, 0)),
                pl.BlockSpec((F, H), lambda i: (0, 0)),
                pl.BlockSpec((H, A), lambda i: (0, 0)),
            ],
            out_specs=pl.BlockSpec((tile_b, A), lambda i: (i, 0)),
            compiler_params=pltpu.CompilerParams(
                dimension_semantics=("parallel",)),
        )(x, w1t, w2t)

    # Small-batch path: no grid, whole arrays resident in VMEM (always legal —
    # block == full array), no pipeline-loop overhead.
    return pl.pallas_call(
        _polgrad_kernel,
        out_shape=jax.ShapeDtypeStruct((B, A), jnp.float32),
        in_specs=[
            pl.BlockSpec(memory_space=pltpu.MemorySpace.VMEM),
            pl.BlockSpec(memory_space=pltpu.MemorySpace.VMEM),
            pl.BlockSpec(memory_space=pltpu.MemorySpace.VMEM),
        ],
        out_specs=pl.BlockSpec(memory_space=pltpu.MemorySpace.VMEM),
    )(x, w1t, w2t)


def _torch_style_linear_init(key, out_features, in_features):
    # PyTorch nn.Linear default: U(-1/sqrt(fan_in), 1/sqrt(fan_in))
    bound = 1.0 / np.sqrt(in_features)
    return jax.random.uniform(key, (out_features, in_features),
                              minval=-bound, maxval=bound, dtype=jnp.float32)


if __name__ == "__main__":
    n_features = 32
    n_actions = 4
    hidden = 64
    batch = 8

    key = jax.random.PRNGKey(0)
    k_x, k_w1, k_w2, k_xb = jax.random.split(key, 4)

    x = jax.random.normal(k_x, (batch, n_features), dtype=jnp.float32)
    w1 = _torch_style_linear_init(k_w1, hidden, n_features)   # dense1.weight [64, 32]
    w2 = _torch_style_linear_init(k_w2, n_actions, hidden)    # dense2.weight [4, 64]

    # One-time (init-time) transpose of the static weights into standard NN
    # layout — zero per-call cost, no in-kernel transpose needed.
    w1t = jnp.asarray(w1.T)   # [F, H]
    w2t = jnp.asarray(w2.T)   # [H, A]

    # --- small-batch (single block) path ---
    out = jax.block_until_ready(polgrad_forward(x, w1t, w2t))
    assert out.shape == (batch, n_actions)

    ref = jax.nn.softmax(jnp.maximum(x @ w1.T, 0.0) @ w2.T, axis=-1)
    np.testing.assert_allclose(np.asarray(out), np.asarray(ref),
                               rtol=2e-2, atol=2e-2)
    np.testing.assert_allclose(np.asarray(out).sum(axis=-1), 1.0,
                               rtol=1e-5, atol=1e-5)

    # --- batched / tiled path (the throughput lever from the review) ---
    big_batch = 256
    xb = jax.random.normal(k_xb, (big_batch, n_features), dtype=jnp.float32)
    out_b = jax.block_until_ready(polgrad_forward(xb, w1t, w2t, tile_b=128))
    assert out_b.shape == (big_batch, n_actions)

    ref_b = jax.nn.softmax(jnp.maximum(xb @ w1.T, 0.0) @ w2.T, axis=-1)
    np.testing.assert_allclose(np.asarray(out_b), np.asarray(ref_b),
                               rtol=2e-2, atol=2e-2)
    np.testing.assert_allclose(np.asarray(out_b).sum(axis=-1), 1.0,
                               rtol=1e-5, atol=1e-5)

    print("KERNEL_OK")
</pallas_src>

<mosaic_0001>
module attributes {stable_mosaic.version = 11 : i64} {
  func.func @_polgrad_kernel(%arg0: memref<8x32xf32, #tpu.memory_space<vmem>>, %arg1: memref<32x64xf32, #tpu.memory_space<vmem>>, %arg2: memref<64x4xf32, #tpu.memory_space<vmem>>, %arg3: memref<8x4xf32, #tpu.memory_space<vmem>>) attributes {dimension_semantics = [], scalar_prefetch = 0 : i64, scratch_operands = 0 : i64, tpu.core_type = #tpu.core_type<tc>} {
    %c0 = arith.constant 0 : index
    %c0_0 = arith.constant 0 : index
    %0 = vector.load %arg0[%c0, %c0_0] : memref<8x32xf32, #tpu.memory_space<vmem>>, vector<8x32xf32>
    %c0_1 = arith.constant 0 : index
    %c0_2 = arith.constant 0 : index
    %1 = vector.load %arg1[%c0_1, %c0_2] : memref<32x64xf32, #tpu.memory_space<vmem>>, vector<32x64xf32>
    %c0_3 = arith.constant 0 : index
    %c0_4 = arith.constant 0 : index
    %2 = vector.load %arg2[%c0_3, %c0_4] : memref<64x4xf32, #tpu.memory_space<vmem>>, vector<64x4xf32>
    %cst = arith.constant dense<0.000000e+00> : vector<8x64xf32>
    %3 = tpu.matmul %0, %1, %cst {dimension_numbers = #tpu.dot_dimension_numbers<[1], [0], [0], [1], [0, 0, 1, 1], [], []>} : vector<8x32xf32>, vector<32x64xf32>, vector<8x64xf32> -> vector<8x64xf32>
    %cst_5 = arith.constant 0.000000e+00 : f32
    %4 = vector.broadcast %cst_5 : f32 to vector<8x64xf32>
    %5 = arith.maximumf %3, %4 : vector<8x64xf32>
    %cst_6 = arith.constant dense<0.000000e+00> : vector<8x4xf32>
    %6 = tpu.matmul %5, %2, %cst_6 {dimension_numbers = #tpu.dot_dimension_numbers<[1], [0], [0], [1], [0, 0, 1, 1], [], []>} : vector<8x64xf32>, vector<64x4xf32>, vector<8x4xf32> -> vector<8x4xf32>
    %cst_7 = arith.constant dense<0xFF800000> : vector<8xf32>
    %7 = vector.multi_reduction <maximumf>, %6, %cst_7 [1] : vector<8x4xf32> to vector<8xf32>
    %8 = vector.shape_cast %7 : vector<8xf32> to vector<8x1xf32>
    %9 = vector.broadcast %8 : vector<8x1xf32> to vector<8x4xf32>
    %10 = arith.subf %6, %9 : vector<8x4xf32>
    %11 = math.exp %10 : vector<8x4xf32>
    %cst_8 = arith.constant dense<0.000000e+00> : vector<8xf32>
    %12 = vector.multi_reduction <add>, %11, %cst_8 [1] : vector<8x4xf32> to vector<8xf32>
    %13 = vector.shape_cast %12 : vector<8xf32> to vector<8x1xf32>
    %14 = vector.broadcast %13 : vector<8x1xf32> to vector<8x4xf32>
    %15 = arith.divf %11, %14 : vector<8x4xf32>
    %c0_9 = arith.constant 0 : index
    %c0_10 = arith.constant 0 : index
    %16 = vector.load %arg3[%c0_9, %c0_10] : memref<8x4xf32, #tpu.memory_space<vmem>>, vector<8x4xf32>
    tpu.vector_store %arg3[%c0_9, %c0_10], %15 {strides = array<i32>} : memref<8x4xf32, #tpu.memory_space<vmem>>, vector<8x4xf32>,
    return
  }
}

</mosaic_0001>

<bundles_post_ra>
// kernel: tpu_custom_call.1
= control target key start
LH: loop header
LB: loop body
LE: loop exit
PB: predicated region body
PF: predicated region fallthrough
CT: control target
= control target key end

     0   :  { %v264_v0 = vmov 0.0|0.0   ;;  %vm265_vm0 = vmmov 0   ;;  %v266_v4 = vmov 0.0   ;;  %vm27_vm1 = vcmask 261120   ;;  %s332_s1 = inlined_call_operand.vmem [shape: f32[32,64], index: 1, kind: input, shape index: {}]   ;;  %s333_s2 = inlined_call_operand.vmem [shape: f32[64,4], index: 2, kind: input, shape index: {}]   ;;  %s334_s0 = inlined_call_operand.vmem [shape: f32[8,32], index: 0, kind: input, shape index: {}]   ;;  %s335_s3 = inlined_call_operand.vmem [shape: f32[8,4], index: 3, kind: output, shape index: {}]  }
   0x1   :  { %239 = vmatprep.subr.bf16.mxu0 %v264_v0  ;;  %v15_v1 = vld [vmem:[%s332_s1] sm:$0xff]  ;;  %v16_v2 = vld [vmem:[%s332_s1 + $0x8] sm:$0xff]  ;;  %v17_v3 = vld [vmem:[%s332_s1 + $0x10] sm:$0xff]  ;;  %217 = vmatprep.mubr.msk.f32.mxu0 %vm265_vm0, %v266_v4  ;;  %vm102_vm2 = vcmask 523264   ;;  %vm176_vm3 = vcmask 31744  }
   0x2   :  { %v240_v5 = vpack.c.bf16 %v16_v2, %v15_v1  ;;  %v18_v6 = vld [vmem:[%s332_s1 + $0x18] sm:$0xff]  ;;  %245 = vmatprep.subr.bf16.mxu1 %v264_v0  ;;  %v19_v7 = vld [vmem:[%s333_s2] sm:$0xff]  ;;  %236 = vmatprep.mubr.msk.f32.mxu1 %vm265_vm0, %v266_v4  ;;  %v20_v8 = vld [vmem:[%s333_s2 + $0x8] sm:$0xff] }
   0x3   :  { %v21_v9 = vld [vmem:[%s333_s2 + $0x10] sm:$0xff]  ;;  %v22_v10 = vld [vmem:[%s333_s2 + $0x18] sm:$0xff]  ;;  %v243_v11 = vpack.c.bf16 %v18_v6, %v17_v3  ;;  %v246_v12 = vpack.c.bf16 %v20_v8, %v19_v7  ;;  %v23_v14 = vld [vmem:[%s333_s2 + $0x20] sm:$0xff] }
   0x4   :  { %241 = vmatpush3.bf16.msra.mxu0 %v240_v5  ;;  %v249_v13 = vpack.c.bf16 %v22_v10, %v21_v9  ;;  %v24_v15 = vld [vmem:[%s333_s2 + $0x28] sm:$0xff]  ;;  %v14_v16 = vld [vmem:[%s334_s0] sm:$0xff]  ;;  %v25_v18 = vld [vmem:[%s333_s2 + $0x30] sm:$0xff] }
   0x5   :  { %242 = vmatprep.subr.bf16.mxu0 %v264_v0  ;;  %247 = vmatpush3.bf16.msra.mxu1 %v246_v12  ;;  %v252_v17 = vpack.c.bf16 %v24_v15, %v23_v14  ;;  %v26_v19 = vld [vmem:[%s333_s2 + $0x38] sm:$0xff] }
   0x6   :  { %248 = vmatprep.subr.bf16.mxu1 %v264_v0  ;;  %v255_v20 = vpack.c.bf16 %v26_v19, %v25_v18 }
   0x8   :  { %244 = vmatpush3.bf16.msra.mxu0 %v243_v11 }
   0x9   :  { %250 = vmatpush3.bf16.msra.mxu1 %v249_v13 }
   0xa   :  { %251 = vmatprep.subr.bf16.mxu1 %v264_v0 }
   0xb   :  { %218 = vmatmul.mubr.msk.f32.vlgmr.msra.gmra.mrb[0].mxu0 %vm27_vm1, %v14_v16 }
   0xd   :  { %253 = vmatpush3.bf16.msra.mxu1 %v252_v17 }
   0xe   :  { %254 = vmatprep.subr.bf16.mxu1 %v264_v0 }
  0x11   :  { %256 = vmatpush3.bf16.msra.mxu1 %v255_v20 }
  0xde   :  { %v97_v21 = vpop.f32.mrb[0].mxu0 }
  0xdf   :  { %v101_v22 = vmax.f32 %v97_v21, 0.0  ;;  %v219_v23 = vpop.f32.mrb[1].mxu0 }
  0xe1   :  { %237 = vmatmul.mubr.msk.f32.vlgmr.msra.gmra.mrb[0].mxu1 %vm102_vm2, %v101_v22 }
 0x1b4   :  { %v172_v24 = vpop.f32.mrb[0].mxu1 }
 0x1b5   :  { %v238_v25 = vpop.f32.mrb[1].mxu1  ;;  %v177_v26 = vsel %vm176_vm3, %v172_v24, -inf }
 0x1b6   :  { %178 = vmax.xlane.f32.xlu0 %v177_v26 }
 0x243   :  { %v179_v27 = vpop.xlane.xlu0 %178 }
 0x244   :  { %v180_v28 = vsub.f32 %v172_v24, %v179_v27 }
 0x246   :  { %v181_v29 = vmul.f32 1.442695, %v180_v28 }
 0x248   :  { %260 = vpow2.f32 %v181_v29 }
 0x252   :  { %v261_v30 = vpop.eup %260 }
 0x253   :  { %v183_v31 = vsel %vm176_vm3, %v261_v30, 0.0 }
 0x254   :  { %184 = vadd.xlane.f32.xlu0 %v183_v31 }
 0x2e1   :  { %v185_v32 = vpop.xlane.xlu0 %184 }
 0x2e2   :  { %262 = vrcp.f32 %v185_v32 }
 0x2ec   :  { %v263_v33 = vpop.eup %262 }
 0x2ed   :  { %v187_v34 = vmul.f32 %v263_v33, %v261_v30 }
 0x2ef   :  { %188 = vst.msk [vmem:[%s335_s3] sm:$0xff] %vm176_vm3, %v187_v34 }

</bundles_post_ra>
